<compile_context>
chip_gen: v6e
topology: v6e:2x2x1
jax: 0.10.0
libtpu: 0.0.40
codegen_flags: <defaults>
</compile_context>

<pallas_src>
import functools
import math

import jax
import jax.numpy as jnp
from jax.experimental import pallas as pl
from jax.experimental.pallas import tpu as pltpu


# --------------------------------------------------------------------------
# helpers
# --------------------------------------------------------------------------
def _round_up(x, m):
    return ((x + m - 1) // m) * m


def _default_vmem_limit():
    """Per-generation VMEM budget: ~85% of physical, capped at 112 MiB."""
    cap = 64 << 20  # conservative fallback (v7x per-TensorCore VMEM)
    try:
        info = pltpu.get_tpu_info()
        c = int(getattr(info, "vmem_capacity_bytes", 0))
        if c > 0:
            cap = c
    except Exception:
        pass
    return max(32 << 20, min(int(cap * 0.85), 112 << 20))


def _largest_divisor_tile(total, unit, max_tile):
    """Largest multiple of `unit` that divides `total` (a multiple of `unit`)
    and is <= max_tile.  Guarantees zero padding overshoot along this axis."""
    u = total // unit
    cap = max(1, max_tile // unit)
    best = 1
    d = 1
    while d * d <= u:
        if u % d == 0:
            if d <= cap:
                best = max(best, d)
            od = u // d
            if od <= cap:
                best = max(best, od)
        d += 1
    return best * unit


def _balanced_tile(total, unit, max_tile):
    """Tile (multiple of `unit`, ~<= max_tile) minimizing round-up overshoot."""
    num = max(1, -(-total // max_tile))      # ceil(total / max_tile)
    tile = -(-total // num)                  # ceil(total / num)
    return -(-tile // unit) * unit           # round up to unit


# --------------------------------------------------------------------------
# kernels
# --------------------------------------------------------------------------
def _linear_relu_kernel(x_ref, w_ref, b_ref, o_ref):
    """Grid (m, n, k).  x:(bm,bk) f32, w:(bk,bn) bf16, b:(1,bn) f32, o:(bm,bn) f32.
    The output block index (i, j) is constant across k -> o_ref is the
    resident accumulator."""
    k = pl.program_id(2)
    part = jnp.dot(x_ref[...].astype(w_ref.dtype), w_ref[...],
                   preferred_element_type=jnp.float32)

    @pl.when(k == 0)
    def _():
        o_ref[...] = part

    @pl.when(k > 0)
    def _():
        o_ref[...] += part

    @pl.when(k == pl.num_programs(2) - 1)
    def _():
        o_ref[...] = jnp.maximum(o_ref[...] + b_ref[...], 0.0)


def _linear_ln_relu_kernel(x_ref, w_ref, b_ref, g_ref, bt_ref, o_ref, *,
                           eps: float, out_dim: int):
    """Grid (m, k), N kept whole so LayerNorm statistics are exact.
    Padded lanes of (acc + bias) are exactly zero (zero-padded weight columns
    and bias), so the stats need no lane mask -- just divide by out_dim."""
    k = pl.program_id(1)
    part = jnp.dot(x_ref[...].astype(w_ref.dtype), w_ref[...],
                   preferred_element_type=jnp.float32)

    @pl.when(k == 0)
    def _():
        o_ref[...] = part

    @pl.when(k > 0)
    def _():
        o_ref[...] += part

    @pl.when(k == pl.num_programs(1) - 1)
    def _():
        y = o_ref[...] + b_ref[...]
        inv_n = 1.0 / float(out_dim)
        mean = jnp.sum(y, axis=-1, keepdims=True) * inv_n
        var = jnp.sum(y * y, axis=-1, keepdims=True) * inv_n - mean * mean
        inv = jax.lax.rsqrt(jnp.maximum(var, 0.0) + eps)   # EUP slot
        # padded gamma/beta lanes are zero -> padded output lanes stay zero.
        o_ref[...] = jnp.maximum((y - mean) * inv * g_ref[...] + bt_ref[...], 0.0)


# --------------------------------------------------------------------------
# parameter prep (one-time, hoisted out of the per-call path)
# --------------------------------------------------------------------------
def prepare_hidden_layer_params(weight, bias, gamma=None, beta=None, *,
                                layer_norm=False, compute_dtype=jnp.bfloat16):
    """Pad + cast + transpose the Linear/LayerNorm parameters ONCE.

    weight: (out_dim, in_dim) f32 (PyTorch nn.Linear layout)
    Returns a dict to be reused across calls (no per-call weight HBM pass).
    """
    out_dim, in_dim = weight.shape
    k_pad = _round_up(in_dim, 128)
    n_pad = _round_up(out_dim, 128)

    w_t = jnp.zeros((k_pad, n_pad), compute_dtype)
    w_t = w_t.at[:in_dim, :out_dim].set(weight.T.astype(compute_dtype))
    b_p = jnp.zeros((1, n_pad), jnp.float32).at[:, :out_dim].set(
        bias.astype(jnp.float32))

    params = dict(w_t=w_t, b=b_p, in_dim=in_dim, out_dim=out_dim,
                  layer_norm=layer_norm)
    if layer_norm:
        assert gamma is not None and beta is not None
        params["gamma"] = jnp.zeros((1, n_pad), jnp.float32).at[:, :out_dim].set(
            gamma.astype(jnp.float32))
        params["beta"] = jnp.zeros((1, n_pad), jnp.float32).at[:, :out_dim].set(
            beta.astype(jnp.float32))
    return params


# --------------------------------------------------------------------------
# per-call apply
# --------------------------------------------------------------------------
def hidden_layer_apply(params, x, *, eps=1e-5, bm=None, bk=None, bn=None,
                       vmem_limit=None):
    """x: (B, in_dim) f32 -> (B, out_dim) f32  (Linear -> [LayerNorm] -> ReLU)."""
    in_dim, out_dim = params["in_dim"], params["out_dim"]
    layer_norm = params["layer_norm"]
    w_t, b_p = params["w_t"], params["b"]
    k_pad, n_pad = w_t.shape

    B = x.shape[0]
    assert x.shape[1] == in_dim

    if vmem_limit is None:
        vmem_limit = _default_vmem_limit()
    big_vmem = vmem_limit >= (96 << 20)          # v5e / v6e
    target_m = 256 if big_vmem else 128
    max_bk = 1024 if big_vmem else 512
    max_bn = 512

    # ---- tile selection (exact divisors; minimal M overshoot) -------------
    m_pad0 = _round_up(B, 8)
    if bm is None:
        bm = _balanced_tile(m_pad0, 8, target_m)
    bm = min(_round_up(bm, 8), m_pad0)
    m_pad = _round_up(m_pad0, bm)

    bk = _largest_divisor_tile(k_pad, 128, max_bk if bk is None else max(128, bk))
    if layer_norm:
        bn = n_pad                                # N whole -> exact LN stats
    else:
        bn = _largest_divisor_tile(n_pad, 128, max_bn if bn is None else max(128, bn))

    # ---- shrink tiles if double-buffered demand would overflow VMEM -------
    def _demand(bm_, bk_, bn_):
        return (2 * bm_ * bk_ * 4                       # x tile (f32)
                + 2 * bk_ * bn_ * w_t.dtype.itemsize    # weight tile
                + 2 * bm_ * bn_ * 4                     # out tile (f32, acc)
                + 8 * bn_ * 4)                          # bias / gamma / beta
    budget = int(vmem_limit * 0.8)
    while _demand(bm, bk, bn) > budget:
        if bk > 128:
            bk = _largest_divisor_tile(k_pad, 128, bk // 2)
        elif (not layer_norm) and bn > 128:
            bn = _largest_divisor_tile(n_pad, 128, bn // 2)
        elif bm > 8:
            bm = max(8, _round_up(bm // 2, 8))
            m_pad = _round_up(m_pad0, bm)
        else:
            # TODO(synk): two-pass LayerNorm (partial sum/sumsq) for out_dim
            # too large to keep a whole row in VMEM.
            break

    # ---- pad x only if actually unaligned (stays f32; cast in-kernel) -----
    if (B, in_dim) != (m_pad, k_pad):
        x_p = jnp.zeros((m_pad, k_pad), x.dtype).at[:B, :in_dim].set(x)
    else:
        x_p = x

    grid_m, grid_k = m_pad // bm, k_pad // bk

    flops = 2 * B * in_dim * out_dim
    bytes_accessed = (B * in_dim * 4 + w_t.size * w_t.dtype.itemsize
                      + B * out_dim * 4 + n_pad * 4 * (4 if layer_norm else 2))
    cost = pl.CostEstimate(flops=int(flops),
                           transcendentals=int(B if layer_norm else 0),
                           bytes_accessed=int(bytes_accessed))

    if layer_norm:
        kernel = functools.partial(_linear_ln_relu_kernel, eps=eps, out_dim=out_dim)
        grid = (grid_m, grid_k)
        vec = pl.BlockSpec((1, n_pad), lambda i, k: (0, 0))
        in_specs = [
            pl.BlockSpec((bm, bk), lambda i, k: (i, k)),        # x tile
            pl.BlockSpec((bk, n_pad), lambda i, k: (k, 0)),     # weight tile
            vec, vec, vec,                                      # bias, gamma, beta
        ]
        out_specs = pl.BlockSpec((bm, n_pad), lambda i, k: (i, 0))
        operands = (x_p, w_t, b_p, params["gamma"], params["beta"])
        dims = ("parallel", "arbitrary")
    else:
        kernel = _linear_relu_kernel
        grid_n = n_pad // bn
        grid = (grid_m, grid_n, grid_k)
        in_specs = [
            pl.BlockSpec((bm, bk), lambda i, j, k: (i, k)),     # x tile
            pl.BlockSpec((bk, bn), lambda i, j, k: (k, j)),     # weight tile
            pl.BlockSpec((1, bn), lambda i, j, k: (0, j)),      # bias
        ]
        out_specs = pl.BlockSpec((bm, bn), lambda i, j, k: (i, j))
        operands = (x_p, w_t, b_p)
        dims = ("parallel", "parallel", "arbitrary")

    out = pl.pallas_call(
        kernel,
        out_shape=jax.ShapeDtypeStruct((m_pad, n_pad), jnp.float32),
        grid_spec=pltpu.PrefetchScalarGridSpec(
            num_scalar_prefetch=0,
            grid=grid,
            in_specs=in_specs,
            out_specs=out_specs,
        ),
        compiler_params=pltpu.CompilerParams(
            dimension_semantics=dims,
            vmem_limit_bytes=int(vmem_limit),
        ),
        cost_estimate=cost,
    )(*operands)

    if (m_pad, n_pad) != (B, out_dim):
        out = out[:B, :out_dim]
    return out


def hidden_layer(x, weight, bias, gamma=None, beta=None, *, layer_norm=False,
                 eps=1e-5, compute_dtype=jnp.bfloat16, bm=None, bk=None, bn=None):
    """One-shot convenience wrapper (prep + apply). For repeated calls, use
    prepare_hidden_layer_params() once and hidden_layer_apply() per call."""
    params = prepare_hidden_layer_params(weight, bias, gamma, beta,
                                         layer_norm=layer_norm,
                                         compute_dtype=compute_dtype)
    return hidden_layer_apply(params, x, eps=eps, bm=bm, bk=bk, bn=bn)


# --------------------------------------------------------------------------
# reference + test harness
# --------------------------------------------------------------------------
def _init_linear_params(key, in_dim, out_dim):
    """Deterministic init mirroring PyTorch nn.Linear defaults."""
    kw, kb = jax.random.split(key)
    bound = 1.0 / math.sqrt(in_dim)
    weight = jax.random.uniform(kw, (out_dim, in_dim), jnp.float32,
                                minval=-bound, maxval=bound)
    bias = jax.random.uniform(kb, (out_dim,), jnp.float32,
                              minval=-bound, maxval=bound)
    return weight, bias


def _reference(x, weight, bias, gamma, beta, layer_norm, eps=1e-5,
               compute_dtype=jnp.bfloat16):
    # Mirrors the kernel numerics: bf16-quantized matmul inputs, f32
    # accumulation, f32 epilogue.
    xq = x.astype(compute_dtype).astype(jnp.float32)
    wq = weight.astype(compute_dtype).astype(jnp.float32)
    y = xq @ wq.T + bias
    if layer_norm:
        mean = jnp.mean(y, axis=-1, keepdims=True)
        var = jnp.mean((y - mean) ** 2, axis=-1, keepdims=True)
        y = (y - mean) / jnp.sqrt(var + eps) * gamma + beta
    return jnp.maximum(y, 0.0)


if __name__ == "__main__":
    key = jax.random.PRNGKey(0)
    ok = True

    # 1) aligned-ish small shapes (single tile after padding)
    # 2) unaligned shapes + forced bk=128 -> multi-K grid, padded-lane LN stats
    # 3) out_dim > 128 + forced bn/bk=128 -> N-tiled grid (non-LN path),
    #    multi-K accumulation in the resident output block
    configs = [
        dict(batch=8, in_dim=32, out_dim=64, bm=None, bk=None, bn=None),
        dict(batch=10, in_dim=300, out_dim=70, bm=8, bk=128, bn=None),
        dict(batch=24, in_dim=256, out_dim=200, bm=None, bk=128, bn=128),
    ]

    for cfg in configs:
        key, k_x, k_lin = jax.random.split(key, 3)
        B, in_dim, out_dim = cfg["batch"], cfg["in_dim"], cfg["out_dim"]
        x = jax.random.normal(k_x, (B, in_dim), jnp.float32)
        weight, bias = _init_linear_params(k_lin, in_dim, out_dim)
        gamma = jnp.ones((out_dim,), jnp.float32)    # nn.LayerNorm default weight
        beta = jnp.zeros((out_dim,), jnp.float32)    # nn.LayerNorm default bias

        for layer_norm in (False, True):
            # one-time param prep (weight transposed/padded/cast once)
            params = prepare_hidden_layer_params(
                weight, bias,
                gamma if layer_norm else None,
                beta if layer_norm else None,
                layer_norm=layer_norm)
            out = hidden_layer_apply(params, x,
                                     bm=cfg["bm"], bk=cfg["bk"], bn=cfg["bn"])
            jax.block_until_ready(out)
            ref = _reference(x, weight, bias, gamma, beta, layer_norm)
            if out.shape != ref.shape or not jnp.allclose(out, ref,
                                                          atol=1e-3, rtol=1e-3):
                ok = False
                err = float(jnp.max(jnp.abs(out - ref))) if out.shape == ref.shape else -1.0
                print(f"MISMATCH cfg={cfg} layer_norm={layer_norm} max_err={err}")

    if ok:
        print("KERNEL_OK")
</pallas_src>

<mosaic_0001>
module attributes {stable_mosaic.version = 11 : i64} {
  func.func @_linear_relu_kernel(%arg0: i32, %arg1: i32, %arg2: i32, %arg3: memref<8x128xf32, #tpu.memory_space<vmem>>, %arg4: memref<128x128xbf16, #tpu.memory_space<vmem>>, %arg5: memref<1x128xf32, #tpu.memory_space<vmem>>, %arg6: memref<8x128xf32, #tpu.memory_space<vmem>>) attributes {dimension_semantics = [#tpu.dimension_semantics<parallel>, #tpu.dimension_semantics<parallel>, #tpu.dimension_semantics<arbitrary>], iteration_bounds = array<i64: 1, 1, 1>, scalar_prefetch = 0 : i64, scratch_operands = 0 : i64, tpu.core_type = #tpu.core_type<tc>, window_params = [{transform_indices = @transform_0, window_bounds = array<i64: 8, 128>}, {transform_indices = @transform_1, window_bounds = array<i64: 128, 128>}, {transform_indices = @transform_2, window_bounds = array<i64: 1, 128>}, {transform_indices = @transform_3, window_bounds = array<i64: 8, 128>}]} {
    %c0 = arith.constant 0 : index
    %c0_0 = arith.constant 0 : index
    %0 = vector.load %arg3[%c0, %c0_0] : memref<8x128xf32, #tpu.memory_space<vmem>>, vector<8x128xf32>
    %1 = arith.truncf %0 : vector<8x128xf32> to vector<8x128xbf16>
    %c0_1 = arith.constant 0 : index
    %c0_2 = arith.constant 0 : index
    %2 = vector.load %arg4[%c0_1, %c0_2] : memref<128x128xbf16, #tpu.memory_space<vmem>>, vector<128x128xbf16>
    %cst = arith.constant dense<0.000000e+00> : vector<8x128xf32>
    %3 = tpu.matmul %1, %2, %cst {dimension_numbers = #tpu.dot_dimension_numbers<[1], [0], [0], [1], [0, 0, 1, 1], [], []>} : vector<8x128xbf16>, vector<128x128xbf16>, vector<8x128xf32> -> vector<8x128xf32>
    %c0_i32 = arith.constant 0 : i32
    %4 = arith.cmpi eq, %arg2, %c0_i32 : i32
    %5 = arith.extui %4 : i1 to i32
    %c0_i32_3 = arith.constant 0 : i32
    %6 = arith.cmpi ne, %5, %c0_i32_3 : i32
    scf.if %6 {
      %c0_8 = arith.constant 0 : index
      %c0_9 = arith.constant 0 : index
      %13 = vector.load %arg6[%c0_8, %c0_9] : memref<8x128xf32, #tpu.memory_space<vmem>>, vector<8x128xf32>
      tpu.vector_store %arg6[%c0_8, %c0_9], %3 {strides = array<i32>} : memref<8x128xf32, #tpu.memory_space<vmem>>, vector<8x128xf32>,
    } else {
    }
    %c0_i32_4 = arith.constant 0 : i32
    %7 = arith.cmpi sgt, %arg2, %c0_i32_4 : i32
    %8 = arith.extui %7 : i1 to i32
    %c0_i32_5 = arith.constant 0 : i32
    %9 = arith.cmpi ne, %8, %c0_i32_5 : i32
    scf.if %9 {
      %c0_8 = arith.constant 0 : index
      %c0_9 = arith.constant 0 : index
      %13 = vector.load %arg6[%c0_8, %c0_9] : memref<8x128xf32, #tpu.memory_space<vmem>>, vector<8x128xf32>
      %14 = arith.addf %13, %3 : vector<8x128xf32>
      %c0_10 = arith.constant 0 : index
      %c0_11 = arith.constant 0 : index
      %15 = vector.load %arg6[%c0_10, %c0_11] : memref<8x128xf32, #tpu.memory_space<vmem>>, vector<8x128xf32>
      tpu.vector_store %arg6[%c0_10, %c0_11], %14 {strides = array<i32>} : memref<8x128xf32, #tpu.memory_space<vmem>>, vector<8x128xf32>,
    } else {
    }
    %c0_i32_6 = arith.constant 0 : i32
    %10 = arith.cmpi eq, %arg2, %c0_i32_6 : i32
    %11 = arith.extui %10 : i1 to i32
    %c0_i32_7 = arith.constant 0 : i32
    %12 = arith.cmpi ne, %11, %c0_i32_7 : i32
    scf.if %12 {
      %c0_8 = arith.constant 0 : index
      %c0_9 = arith.constant 0 : index
      %13 = vector.load %arg6[%c0_8, %c0_9] : memref<8x128xf32, #tpu.memory_space<vmem>>, vector<8x128xf32>
      %c0_10 = arith.constant 0 : index
      %c0_11 = arith.constant 0 : index
      %14 = vector.load %arg5[%c0_10, %c0_11] : memref<1x128xf32, #tpu.memory_space<vmem>>, vector<1x128xf32>
      %15 = vector.broadcast %14 : vector<1x128xf32> to vector<8x128xf32>
      %16 = arith.addf %13, %15 : vector<8x128xf32>
      %cst_12 = arith.constant 0.000000e+00 : f32
      %17 = vector.broadcast %cst_12 : f32 to vector<8x128xf32>
      %18 = arith.maximumf %16, %17 : vector<8x128xf32>
      %c0_13 = arith.constant 0 : index
      %c0_14 = arith.constant 0 : index
      %19 = vector.load %arg6[%c0_13, %c0_14] : memref<8x128xf32, #tpu.memory_space<vmem>>, vector<8x128xf32>
      tpu.vector_store %arg6[%c0_13, %c0_14], %18 {strides = array<i32>} : memref<8x128xf32, #tpu.memory_space<vmem>>, vector<8x128xf32>,
    } else {
    }
    return
  }
  func.func @transform_0(%arg0: i32, %arg1: i32, %arg2: i32) -> (i32, i32) {
    %c0_i32 = arith.constant 0 : i32
    return %arg0, %arg2 : i32, i32
  }
  func.func @transform_1(%arg0: i32, %arg1: i32, %arg2: i32) -> (i32, i32) {
    %c0_i32 = arith.constant 0 : i32
    return %arg2, %arg1 : i32, i32
  }
  func.func @transform_2(%arg0: i32, %arg1: i32, %arg2: i32) -> (i32, i32) {
    %c0_i32 = arith.constant 0 : i32
    %c0_i32_0 = arith.constant 0 : i32
    return %c0_i32, %arg1 : i32, i32
  }
  func.func @transform_3(%arg0: i32, %arg1: i32, %arg2: i32) -> (i32, i32) {
    %c0_i32 = arith.constant 0 : i32
    return %arg0, %arg1 : i32, i32
  }
}

</mosaic_0001>

<bundles_post_ra>
// kernel: tpu_custom_call.1
= control target key start
LH: loop header
LB: loop body
LE: loop exit
PB: predicated region body
PF: predicated region fallthrough
CT: control target
= control target key end

     0   :  { %8 = vsyncpa [#allocation3], 0  ;;  %s348_s0 = inlined_call_operand.hbm [shape: f32[8,128], index: 0, kind: input, shape index: {}]   ;;  %s349_s1 = inlined_call_operand.hbm [shape: bf16[128,128], index: 1, kind: input, shape index: {}]   ;;  %s350_s2 = inlined_call_operand.vmem [shape: f32[1,128], index: 2, kind: input, shape index: {}]   ;;  %s351_s3 = inlined_call_operand.hbm [shape: f32[8,128], index: 3, kind: output, shape index: {}]  }
   0x1   :  { %9 = vsyncpa [#allocation6], 0 }
   0x2   :  { %10 = vsyncpa [#allocation4], 0  ;;  %s309_s12 = smov [#allocation2]   ;;  %s310_s14 = smov [#allocation5]  }
   0x3   :  { %s17_s13 = sshll.u32 %s309_s12, 4  ;;  %s26_s15 = sshll.u32 %s310_s14, 4  ;;  %s18_s13 = int_to_ptr.vmem [resolvable:$true] %s17_s13  ;;  %s27_s15 = int_to_ptr.vmem [resolvable:$true] %s26_s15 }
   0x4   :  { %s251_s16 = scalar_lea.vmem %s18_s13, 128  ;;  %p256_p1 = scmp.lt.s32.totalorder %s18_s13, %s18_s13 }
   0x5   :  { %p252_p0 = scmp.ne.s32.totalorder %s18_s13, %s251_s16  ;;  %p257_p2 = scmp.lt.s32.totalorder %s251_s16, %s251_s16 }
   0x7   :  { %p258_p3 = por %p257_p2, %p256_p1 }
   0x9   :  { %p259_p4 = pnand %p258_p3, %p252_p0 }
   0xb   :  { %262 = shalt.err (!%p259_p4)
}
   0xc   :  { %20 = dma.hbm_to_vmem [thread:$0]  %s348_s0, 128, %s18_s13, [#allocation3]  }
   0xd   :  { %s271_s19 = scalar_lea.vmem %s27_s15, 1024  ;;  %p276_p6 = scmp.lt.s32.totalorder %s27_s15, %s27_s15 }
   0xe   :  { %p272_p5 = scmp.ne.s32.totalorder %s27_s15, %s271_s19  ;;  %p277_p7 = scmp.lt.s32.totalorder %s271_s19, %s271_s19 }
  0x10   :  { %p278_p8 = por %p277_p7, %p276_p6 }
  0x12   :  { %p279_p9 = pnand %p278_p8, %p272_p5 }
  0x14   :  { %282 = shalt.err (!%p279_p9)
}
  0x15   :  { %s311_s20 = smov 64   ;;  %s312_s21 = smov 4  }
  0x16   :  { %32 = dma.hbm_to_vmem [thread:$0]  %s349_s1, 1024, %s27_s15, [#allocation6], %s311_s20, %s311_s20, %s312_s21  }
  0x17   :  { %303 = dma.done.wait [#allocation3], 128  }
  0x18   :  { %304 = vsyncadd [#allocation3], 4294967168 }
  0x19   :  { %305 = dma.done.wait [#allocation6], 1024  }
  0x1a   :  { %306 = vsyncadd [#allocation6], 4294966272  ;;  %v313_v0 = vmov 0.0   ;;  %vm314_vm0 = vmmov 0   ;;  %v235_v1 = vld [vmem:[#allocation5 + $0x38] sm:$0xff]   ;;  %v236_v2 = vld [vmem:[#allocation5 + $0x30] sm:$0xff]  }
  0x1b   :  { %208 = vmatprep.subr.bf16.mxu0 %v313_v0  ;;  %224 = vmatprep.mubr.msk.bf16.mxu0 %vm314_vm0, %v313_v0  ;;  %v237_v3 = vld [vmem:[#allocation5 + $0x28] sm:$0xff]   ;;  %v238_v4 = vld [vmem:[#allocation5 + $0x20] sm:$0xff]   ;;  %v239_v5 = vld [vmem:[#allocation5 + $0x18] sm:$0xff]   ;;  %s315_s24 = smov [#allocation7]  }
  0x1c   :  { %209 = vmatpush3.bf16.msra.mxu0 %v235_v1  ;;  %v240_v6 = vld [vmem:[#allocation5 + $0x10] sm:$0xff]   ;;  %v241_v7 = vld [vmem:[#allocation5 + $0x8] sm:$0xff]   ;;  %v242_v8 = vld [vmem:[#allocation5] sm:$0xff]   ;;  %s180_s25 = sshll.u32 %s315_s24, 4  ;;  %s181_s25 = int_to_ptr.vmem [resolvable:$true] %s180_s25 }
  0x1d   :  { %210 = vmatprep.subr.bf16.mxu0 %v313_v0  ;;  %v42_v9 = vld [vmem:[#allocation2] sm:$0xff]  ;;  %s283_s26 = scalar_lea.vmem %s181_s25, 128  ;;  %p288_p11 = scmp.lt.s32.totalorder %s181_s25, %s181_s25 }
  0x1e   :  { %v43_v10 = vpack.c.bf16 %v42_v9, %v42_v9  ;;  %v198_v11 = vld [vmem:[%s350_s2] ss:$0 sm:$0xff]  ;;  %p284_p10 = scmp.ne.s32.totalorder %s181_s25, %s283_s26  ;;  %p289_p12 = scmp.lt.s32.totalorder %s283_s26, %s283_s26 }
  0x20   :  { %211 = vmatpush3.bf16.msra.mxu0 %v236_v2  ;;  %p290_p13 = por %p289_p12, %p288_p11 }
  0x21   :  { %212 = vmatprep.subr.bf16.mxu0 %v313_v0 }
  0x22   :  { %p291_p0 = pnand %p290_p13, %p284_p10 }
  0x24   :  { %213 = vmatpush3.bf16.msra.mxu0 %v237_v3 }
  0x25   :  { %214 = vmatprep.subr.bf16.mxu0 %v313_v0 }
  0x28   :  { %215 = vmatpush3.bf16.msra.mxu0 %v238_v4 }
  0x29   :  { %216 = vmatprep.subr.bf16.mxu0 %v313_v0 }
  0x2c   :  { %217 = vmatpush3.bf16.msra.mxu0 %v239_v5 }
  0x2d   :  { %218 = vmatprep.subr.bf16.mxu0 %v313_v0 }
  0x30   :  { %219 = vmatpush3.bf16.msra.mxu0 %v240_v6 }
  0x31   :  { %220 = vmatprep.subr.bf16.mxu0 %v313_v0 }
  0x34   :  { %221 = vmatpush3.bf16.msra.mxu0 %v241_v7 }
  0x35   :  { %222 = vmatprep.subr.bf16.mxu0 %v313_v0 }
  0x38   :  { %223 = vmatpush3.bf16.msra.mxu0 %v242_v8 }
  0x3b   :  { %225 = vmatmul.mubr.bf16.vlgmr.msra.gmra.mxu0 %v43_v10 }
  0xfb   :  { %v142_v12 = vpop.f32.mrf.mxu0 }
  0xfc   :  { %v171_v13 = vadd.f32 %v198_v11, %v142_v12 }
  0xfd   :  { %v226_v14 = vpop.f32.mrf.mxu0 }
  0xfe   :  { %v172_v15 = vmax.f32 %v171_v13, 0.0 }
  0xff   :  { %v145_v16 = vpop.f32.mrf.mxu0 }
 0x100   :  { %173 = vst [vmem:[#allocation7] sm:$0xff] %v172_v15 }
 0x101   :  { %v227_v17 = vpop.f32.mrf.mxu0 }
 0x102   :  { %294 = shalt.err (!%p291_p0)
}
 0x103   :  { %183 = dma.vmem_to_hbm [thread:$0]  %s181_s25, 128, %s351_s3, [#allocation4]  }
 0x104   :  { %307 = dma.done.wait [#allocation4], 128  }
 0x105   :  { %308 = vsyncadd [#allocation4], 4294967168 }
 0x106   :  { %187 = vsyncpa [#allocation3], 1 }
 0x107   :  { %188 = vsyncpa [#allocation6], 1 }
 0x108   :  { %189 = vsyncpa [#allocation4], 1 }

</bundles_post_ra>
